<compile_context>
chip_gen: v5e
topology: v5e:2x2
jax: 0.10.0
libtpu: 0.0.40
codegen_flags: <defaults>
</compile_context>

<pallas_src>
import functools

import jax
import jax.numpy as jnp
from jax import lax
from jax.experimental import pallas as pl
from jax.experimental.pallas import tpu as pltpu

MXU_DTYPE = jnp.bfloat16  # MXU operand dtype; accumulation / epilogue stay f32.


def _round_up(x, m):
    return (x + m - 1) // m * m


def _spa_spe_clip_kernel(xa_ref, xe_ref, w1_ref, w2_ref, b1_ref, b2_ref,
                         out_ref, h_scr, acc_scr, *,
                         inv_t, n_valid, n_pad, tk):
    # Grid: axis 0 = layer (0: Linear+ReLU, 1: Linear + CLIP epilogue),
    #       axis 1 = K-reduction tile over the padded feature dim.
    l = pl.program_id(0)
    k = pl.program_id(1)
    nk = pl.num_programs(1)
    nt = (((1,), (1,)), ((), ()))  # contract last dims: x @ w.T (NT, no transposes)

    @pl.when(k == 0)
    def _():
        acc_scr[...] = jnp.zeros_like(acc_scr)

    # ---- layer 1: partial x @ W1^T for both modalities (shared weight tile) --
    @pl.when(l == 0)
    def _():
        w = w1_ref[...]                                        # [Hp, tk] bf16
        acc_scr[:n_pad, :] += lax.dot_general(
            xa_ref[...], w, nt, preferred_element_type=jnp.float32)
        acc_scr[n_pad:, :] += lax.dot_general(
            xe_ref[...], w, nt, preferred_element_type=jnp.float32)

    # ---- layer 2: partial h1 @ W2^T, h1 streamed from VMEM scratch ----------
    @pl.when(l == 1)
    def _():
        off = pl.multiple_of(k * tk, tk)
        h_in = h_scr[:, pl.ds(off, tk)]                        # [2*n_pad, tk] bf16
        acc_scr[...] += lax.dot_general(
            h_in, w2_ref[...], nt, preferred_element_type=jnp.float32)

    # ---- layer-1 finalize: bias + ReLU -> bf16 activations in scratch -------
    @pl.when((l == 0) & (k == nk - 1))
    def _():
        h1 = jnp.maximum(acc_scr[...] + b1_ref[...], 0.0)      # f32
        h_scr[...] = h1.astype(h_scr.dtype)

    # ---- layer-2 finalize: bias, L2 norm, logits, symmetric CE --------------
    @pl.when((l == 1) & (k == nk - 1))
    def _():
        h = acc_scr[...] + b2_ref[...]                         # [2*n_pad, Hp] f32

        # F.normalize(dim=-1): x * rsqrt(max(ss, eps^2)); temperature 1/t is
        # folded into the h_a per-row scale (no [B,B] divide later).
        def l2norm(v, scale):
            ss = jnp.sum(v * v, axis=-1, keepdims=True)
            return v * (lax.rsqrt(jnp.maximum(ss, 1e-24)) * scale)

        h_a = l2norm(h[:n_pad], inv_t).astype(MXU_DTYPE)
        h_e = l2norm(h[n_pad:], 1.0).astype(MXU_DTYPE)

        # logits[i, j] = <h_a_i, h_e_j> / t  (bf16 MXU, f32 accumulation)
        logits = lax.dot_general(h_a, h_e, nt,
                                 preferred_element_type=jnp.float32)
        # Diagonal (label term of both CEs) straight from the [B,H] tiles.
        diag = jnp.sum(h_a.astype(jnp.float32) * h_e.astype(jnp.float32),
                       axis=-1, keepdims=True)

        # Padding masks from degenerate iotas (broadcasting; no [Bp,Bp] iotas).
        rvalid = lax.broadcasted_iota(jnp.int32, (n_pad, 1), 0) < n_valid
        cvalid = lax.broadcasted_iota(jnp.int32, (1, n_pad), 1) < n_valid
        if n_pad != n_valid:
            logits = jnp.where(rvalid & cvalid, logits, -1e30)

        # Stable row-wise / column-wise logsumexp.
        m_row = jnp.max(logits, axis=-1, keepdims=True)
        lse_row = m_row + jnp.log(
            jnp.sum(jnp.exp(logits - m_row), axis=-1, keepdims=True))
        m_col = jnp.max(logits, axis=0, keepdims=True)
        lse_col = m_col + jnp.log(
            jnp.sum(jnp.exp(logits - m_col), axis=0, keepdims=True))

        if n_pad != n_valid:
            lse_row = jnp.where(rvalid, lse_row, 0.0)
            lse_col = jnp.where(cvalid, lse_col, 0.0)
            diag = jnp.where(rvalid, diag, 0.0)

        loss = (0.5 / n_valid) * (
            jnp.sum(lse_row) + jnp.sum(lse_col) - 2.0 * jnp.sum(diag))
        # Lane-dense output block -> single unmasked vst.
        out_ref[...] = jnp.broadcast_to(loss, out_ref.shape).astype(jnp.float32)


def spa_spe_graph_clip(x_graph_a, x_graph_e, w1, b1, w2, b2, t=1.0):
    """Forward pass of SpaSpeGraph downstream of the encoders.

    Args:
      x_graph_a: [B, H] spatial-graph embeddings (spa_encoder output).
      x_graph_e: [B, H] spectral-graph embeddings (spe_encoder output).
      w1, b1, w2, b2: shared projection MLP parameters (PyTorch [out, in] layout).
      t: temperature.
    Returns:
      scalar f32 CLIP loss.
    """
    B, H = x_graph_a.shape

    # bf16 MXU operands pack 16 rows per sublane group.
    sub = {4: 8, 2: 16, 1: 32}[jnp.dtype(MXU_DTYPE).itemsize]
    Bp = _round_up(max(B, sub), sub)
    Hp = _round_up(max(H, 128), 128)
    tk = 256 if Hp % 256 == 0 else 128     # 256-wide K tiles when Hp allows (v6e/v7x MXU)
    Kt = Hp // tk
    last = Kt - 1

    def pad2(a, rows, cols, dtype):
        a = jnp.asarray(a, dtype)
        pr, pc = rows - a.shape[0], cols - a.shape[1]
        if pr or pc:
            a = jnp.pad(a, ((0, pr), (0, pc)))
        return a

    # Weights keep their PyTorch [out, in] layout (kernel uses NT dot_general),
    # activations/weights are cast to bf16 so streamed bytes are halved; biases
    # stay f32.  No transposes / concatenates.  Pads are no-ops when H, B are
    # already aligned (production case), and XLA folds pad+convert of constant
    # params across steps.
    xa = pad2(x_graph_a, Bp, Hp, MXU_DTYPE)
    xe = pad2(x_graph_e, Bp, Hp, MXU_DTYPE)
    w1p = pad2(w1, Hp, Hp, MXU_DTYPE)
    w2p = pad2(w2, Hp, Hp, MXU_DTYPE)
    b1p = pad2(jnp.asarray(b1, jnp.float32).reshape(1, H), 1, Hp, jnp.float32)
    b2p = pad2(jnp.asarray(b2, jnp.float32).reshape(1, H), 1, Hp, jnp.float32)

    # VMEM budget: double-buffered per-step inputs + scratch + epilogue temps
    # (logits / exp / mask + f32 h_a/h_e copies), 2x headroom, capped per
    # generation at ~0.75x physical VMEM.
    bf, f4 = 2, 4
    per_step = 2 * ((2 * Bp * tk + 2 * Hp * tk) * bf + 2 * Hp * f4)
    scratch = 2 * Bp * Hp * (bf + f4)
    epilogue = 3 * Bp * Bp * f4 + 4 * Bp * Hp * f4
    est = per_step + scratch + epilogue
    try:
        cap = int(getattr(pltpu.get_tpu_info(), "vmem_capacity_bytes", 128 << 20))
    except Exception:  # pragma: no cover - info query unavailable
        cap = 128 << 20
    vmem_limit = int(min(max(2 * est, 32 << 20), int(0.75 * cap)))

    # Index maps "park" operands that are idle during the other layer on the
    # block they already hold, so no redundant DMA is issued.
    x_map = lambda l, k: (0, k * (1 - l) + last * l)    # active on layer 0
    w1_map = lambda l, k: (0, k * (1 - l) + last * l)   # active on layer 0
    w2_map = lambda l, k: (0, k * l)                    # active on layer 1
    b_map = lambda l, k: (0, 0)

    out = pl.pallas_call(
        functools.partial(_spa_spe_clip_kernel,
                          inv_t=float(1.0 / t), n_valid=B, n_pad=Bp, tk=tk),
        out_shape=jax.ShapeDtypeStruct((1, 128), jnp.float32),
        grid_spec=pltpu.PrefetchScalarGridSpec(
            num_scalar_prefetch=0,
            grid=(2, Kt),                      # (layer, K) — reduction axis last
            in_specs=[
                pl.BlockSpec((Bp, tk), x_map),    # x_graph_a
                pl.BlockSpec((Bp, tk), x_map),    # x_graph_e
                pl.BlockSpec((Hp, tk), w1_map),   # W1 [out, in]
                pl.BlockSpec((Hp, tk), w2_map),   # W2 [out, in]
                pl.BlockSpec((1, Hp), b_map),     # b1 (f32)
                pl.BlockSpec((1, Hp), b_map),     # b2 (f32)
            ],
            out_specs=pl.BlockSpec((1, 128), lambda l, k: (0, 0)),
            scratch_shapes=[
                pltpu.VMEM((2 * Bp, Hp), MXU_DTYPE),    # layer-1 activations
                pltpu.VMEM((2 * Bp, Hp), jnp.float32),  # f32 accumulator
            ],
        ),
        compiler_params=pltpu.CompilerParams(
            dimension_semantics=("arbitrary", "arbitrary"),
            vmem_limit_bytes=vmem_limit),
    )(xa, xe, w1p, w2p, b1p, b2p)
    return out[0, 0]


def _reference(x_a, x_e, w1, b1, w2, b2, t=1.0):
    """Pure-JAX f32 reference (mirrors the PyTorch module)."""
    def proj(x):
        h = jnp.maximum(x @ w1.T + b1, 0.0)
        return h @ w2.T + b2

    def l2norm(h):
        return h / jnp.maximum(jnp.linalg.norm(h, axis=-1, keepdims=True), 1e-12)

    ha, he = l2norm(proj(x_a)), l2norm(proj(x_e))
    logits = ha @ he.T / t
    labels = jnp.arange(x_a.shape[0])

    def ce(lg):
        lse = jax.scipy.special.logsumexp(lg, axis=-1)
        return jnp.mean(lse - lg[jnp.arange(lg.shape[0]), labels])

    return 0.5 * ce(logits) + 0.5 * ce(logits.T)


if __name__ == "__main__":
    B, H = 8, 32       # batch of graphs, hidden_dim (small demo shapes)
    t = 0.5

    key = jax.random.PRNGKey(0)
    k_xa, k_xe, k_w1, k_b1, k_w2, k_b2 = jax.random.split(key, 6)

    # Encoder outputs (graph-level embeddings).
    # TODO(synk): spa_encoder / spe_encoder are arbitrary external GNNs;
    # their outputs are modeled as kernel inputs here.
    x_graph_a = jax.random.normal(k_xa, (B, H), dtype=jnp.float32)
    x_graph_e = jax.random.normal(k_xe, (B, H), dtype=jnp.float32)

    # Shared projection MLP parameters, nn.Linear-style init (uniform ±1/sqrt(H)).
    bound = 1.0 / (H ** 0.5)
    w1 = jax.random.uniform(k_w1, (H, H), jnp.float32, -bound, bound)
    b1 = jax.random.uniform(k_b1, (H,), jnp.float32, -bound, bound)
    w2 = jax.random.uniform(k_w2, (H, H), jnp.float32, -bound, bound)
    b2 = jax.random.uniform(k_b2, (H,), jnp.float32, -bound, bound)

    loss = spa_spe_graph_clip(x_graph_a, x_graph_e, w1, b1, w2, b2, t=t)
    loss = jax.block_until_ready(loss)

    ref = _reference(x_graph_a, x_graph_e, w1, b1, w2, b2, t=t)
    # bf16 MXU operands vs. the f32 reference -> loosened tolerance.
    assert jnp.allclose(loss, ref, rtol=5e-2, atol=5e-2), (loss, ref)

    print("KERNEL_OK")
</pallas_src>

<mosaic_0001>
module attributes {stable_mosaic.version = 11 : i64} {
  func.func @_spa_spe_clip_kernel(%arg0: i32, %arg1: i32, %arg2: memref<16x128xbf16, #tpu.memory_space<vmem>>, %arg3: memref<16x128xbf16, #tpu.memory_space<vmem>>, %arg4: memref<128x128xbf16, #tpu.memory_space<vmem>>, %arg5: memref<128x128xbf16, #tpu.memory_space<vmem>>, %arg6: memref<1x128xf32, #tpu.memory_space<vmem>>, %arg7: memref<1x128xf32, #tpu.memory_space<vmem>>, %arg8: memref<1x128xf32, #tpu.memory_space<vmem>>, %arg9: memref<32x128xbf16, #tpu.memory_space<vmem>>, %arg10: memref<32x128xf32, #tpu.memory_space<vmem>>) attributes {dimension_semantics = [#tpu.dimension_semantics<arbitrary>, #tpu.dimension_semantics<arbitrary>], iteration_bounds = array<i64: 2, 1>, scalar_prefetch = 0 : i64, scratch_operands = 2 : i64, tpu.core_type = #tpu.core_type<tc>, window_params = [{transform_indices = @transform_0, window_bounds = array<i64: 16, 128>}, {transform_indices = @transform_1, window_bounds = array<i64: 16, 128>}, {transform_indices = @transform_2, window_bounds = array<i64: 128, 128>}, {transform_indices = @transform_3, window_bounds = array<i64: 128, 128>}, {pipeline_mode = #tpu.pipeline_mode<synchronous>, transform_indices = @transform_4, window_bounds = array<i64: 1, 128>}, {pipeline_mode = #tpu.pipeline_mode<synchronous>, transform_indices = @transform_5, window_bounds = array<i64: 1, 128>}, {pipeline_mode = #tpu.pipeline_mode<synchronous>, transform_indices = @transform_6, window_bounds = array<i64: 1, 128>}]} {
    %c0_i32 = arith.constant 0 : i32
    %0 = arith.cmpi eq, %arg1, %c0_i32 : i32
    %1 = arith.extui %0 : i1 to i32
    %c0_i32_0 = arith.constant 0 : i32
    %2 = arith.cmpi ne, %1, %c0_i32_0 : i32
    scf.if %2 {
      %cst = arith.constant 0.000000e+00 : f32
      %19 = vector.broadcast %cst : f32 to vector<32x128xf32>
      %c0 = arith.constant 0 : index
      %c0_10 = arith.constant 0 : index
      %20 = vector.load %arg10[%c0, %c0_10] : memref<32x128xf32, #tpu.memory_space<vmem>>, vector<32x128xf32>
      tpu.vector_store %arg10[%c0, %c0_10], %19 {strides = array<i32>} : memref<32x128xf32, #tpu.memory_space<vmem>>, vector<32x128xf32>,
    } else {
    }
    %c0_i32_1 = arith.constant 0 : i32
    %3 = arith.cmpi eq, %arg0, %c0_i32_1 : i32
    %4 = arith.extui %3 : i1 to i32
    %c0_i32_2 = arith.constant 0 : i32
    %5 = arith.cmpi ne, %4, %c0_i32_2 : i32
    scf.if %5 {
      %c0 = arith.constant 0 : index
      %c0_10 = arith.constant 0 : index
      %19 = vector.load %arg4[%c0, %c0_10] : memref<128x128xbf16, #tpu.memory_space<vmem>>, vector<128x128xbf16>
      %c0_11 = arith.constant 0 : index
      %c0_12 = arith.constant 0 : index
      %20 = vector.load %arg10[%c0_11, %c0_12] : memref<32x128xf32, #tpu.memory_space<vmem>>, vector<16x128xf32>
      %c0_13 = arith.constant 0 : index
      %c0_14 = arith.constant 0 : index
      %21 = vector.load %arg2[%c0_13, %c0_14] : memref<16x128xbf16, #tpu.memory_space<vmem>>, vector<16x128xbf16>
      %cst = arith.constant dense<0.000000e+00> : vector<16x128xf32>
      %22 = tpu.matmul %21, %19, %cst {dimension_numbers = #tpu.dot_dimension_numbers<[1], [1], [0], [0], [0, 0, 1, 0], [], []>} : vector<16x128xbf16>, vector<128x128xbf16>, vector<16x128xf32> -> vector<16x128xf32>
      %23 = arith.addf %20, %22 : vector<16x128xf32>
      %c0_15 = arith.constant 0 : index
      %c0_16 = arith.constant 0 : index
      %24 = vector.load %arg10[%c0_15, %c0_16] : memref<32x128xf32, #tpu.memory_space<vmem>>, vector<16x128xf32>
      tpu.vector_store %arg10[%c0_15, %c0_16], %23 {strides = array<i32>} : memref<32x128xf32, #tpu.memory_space<vmem>>, vector<16x128xf32>,
      %c16 = arith.constant 16 : index
      %c0_17 = arith.constant 0 : index
      %25 = vector.load %arg10[%c16, %c0_17] : memref<32x128xf32, #tpu.memory_space<vmem>>, vector<16x128xf32>
      %c0_18 = arith.constant 0 : index
      %c0_19 = arith.constant 0 : index
      %26 = vector.load %arg3[%c0_18, %c0_19] : memref<16x128xbf16, #tpu.memory_space<vmem>>, vector<16x128xbf16>
      %cst_20 = arith.constant dense<0.000000e+00> : vector<16x128xf32>
      %27 = tpu.matmul %26, %19, %cst_20 {dimension_numbers = #tpu.dot_dimension_numbers<[1], [1], [0], [0], [0, 0, 1, 0], [], []>} : vector<16x128xbf16>, vector<128x128xbf16>, vector<16x128xf32> -> vector<16x128xf32>
      %28 = arith.addf %25, %27 : vector<16x128xf32>
      %c16_21 = arith.constant 16 : index
      %c0_22 = arith.constant 0 : index
      %29 = vector.load %arg10[%c16_21, %c0_22] : memref<32x128xf32, #tpu.memory_space<vmem>>, vector<16x128xf32>
      tpu.vector_store %arg10[%c16_21, %c0_22], %28 {strides = array<i32>} : memref<32x128xf32, #tpu.memory_space<vmem>>, vector<16x128xf32>,
    } else {
    }
    %c1_i32 = arith.constant 1 : i32
    %6 = arith.cmpi eq, %arg0, %c1_i32 : i32
    %7 = arith.extui %6 : i1 to i32
    %c0_i32_3 = arith.constant 0 : i32
    %8 = arith.cmpi ne, %7, %c0_i32_3 : i32
    scf.if %8 {
      %c128_i32 = arith.constant 128 : i32
      %19 = arith.muli %arg1, %c128_i32 : i32
      %20 = tpu.assume_multiple %19, 128 : i32
      %c0 = arith.constant 0 : index
      %21 = arith.index_cast %20 : i32 to index
      %22 = vector.load %arg9[%c0, %21] : memref<32x128xbf16, #tpu.memory_space<vmem>>, vector<32x128xbf16>
      %c0_10 = arith.constant 0 : index
      %c0_11 = arith.constant 0 : index
      %23 = vector.load %arg10[%c0_10, %c0_11] : memref<32x128xf32, #tpu.memory_space<vmem>>, vector<32x128xf32>
      %c0_12 = arith.constant 0 : index
      %c0_13 = arith.constant 0 : index
      %24 = vector.load %arg5[%c0_12, %c0_13] : memref<128x128xbf16, #tpu.memory_space<vmem>>, vector<128x128xbf16>
      %cst = arith.constant dense<0.000000e+00> : vector<32x128xf32>
      %25 = tpu.matmul %22, %24, %cst {dimension_numbers = #tpu.dot_dimension_numbers<[1], [1], [0], [0], [0, 0, 1, 0], [], []>} : vector<32x128xbf16>, vector<128x128xbf16>, vector<32x128xf32> -> vector<32x128xf32>
      %26 = arith.addf %23, %25 : vector<32x128xf32>
      %c0_14 = arith.constant 0 : index
      %c0_15 = arith.constant 0 : index
      %27 = vector.load %arg10[%c0_14, %c0_15] : memref<32x128xf32, #tpu.memory_space<vmem>>, vector<32x128xf32>
      tpu.vector_store %arg10[%c0_14, %c0_15], %26 {strides = array<i32>} : memref<32x128xf32, #tpu.memory_space<vmem>>, vector<32x128xf32>,
    } else {
    }
    %c0_i32_4 = arith.constant 0 : i32
    %9 = arith.cmpi eq, %arg0, %c0_i32_4 : i32
    %c0_i32_5 = arith.constant 0 : i32
    %10 = arith.cmpi eq, %arg1, %c0_i32_5 : i32
    %11 = arith.andi %9, %10 : i1
    %12 = arith.extui %11 : i1 to i32
    %c0_i32_6 = arith.constant 0 : i32
    %13 = arith.cmpi ne, %12, %c0_i32_6 : i32
    scf.if %13 {
      %c0 = arith.constant 0 : index
      %c0_10 = arith.constant 0 : index
      %19 = vector.load %arg10[%c0, %c0_10] : memref<32x128xf32, #tpu.memory_space<vmem>>, vector<32x128xf32>
      %c0_11 = arith.constant 0 : index
      %c0_12 = arith.constant 0 : index
      %20 = vector.load %arg6[%c0_11, %c0_12] : memref<1x128xf32, #tpu.memory_space<vmem>>, vector<1x128xf32>
      %21 = vector.broadcast %20 : vector<1x128xf32> to vector<32x128xf32>
      %22 = arith.addf %19, %21 : vector<32x128xf32>
      %cst = arith.constant 0.000000e+00 : f32
      %23 = vector.broadcast %cst : f32 to vector<32x128xf32>
      %24 = arith.maximumf %22, %23 : vector<32x128xf32>
      %25 = arith.truncf %24 : vector<32x128xf32> to vector<32x128xbf16>
      %c0_13 = arith.constant 0 : index
      %c0_14 = arith.constant 0 : index
      %26 = vector.load %arg9[%c0_13, %c0_14] : memref<32x128xbf16, #tpu.memory_space<vmem>>, vector<32x128xbf16>
      tpu.vector_store %arg9[%c0_13, %c0_14], %25 {strides = array<i32>} : memref<32x128xbf16, #tpu.memory_space<vmem>>, vector<32x128xbf16>,
    } else {
    }
    %c1_i32_7 = arith.constant 1 : i32
    %14 = arith.cmpi eq, %arg0, %c1_i32_7 : i32
    %c0_i32_8 = arith.constant 0 : i32
    %15 = arith.cmpi eq, %arg1, %c0_i32_8 : i32
    %16 = arith.andi %14, %15 : i1
    %17 = arith.extui %16 : i1 to i32
    %c0_i32_9 = arith.constant 0 : i32
    %18 = arith.cmpi ne, %17, %c0_i32_9 : i32
    scf.if %18 {
      %c0 = arith.constant 0 : index
      %c0_10 = arith.constant 0 : index
      %19 = vector.load %arg10[%c0, %c0_10] : memref<32x128xf32, #tpu.memory_space<vmem>>, vector<32x128xf32>
      %c0_11 = arith.constant 0 : index
      %c0_12 = arith.constant 0 : index
      %20 = vector.load %arg7[%c0_11, %c0_12] : memref<1x128xf32, #tpu.memory_space<vmem>>, vector<1x128xf32>
      %21 = vector.broadcast %20 : vector<1x128xf32> to vector<32x128xf32>
      %22 = arith.addf %19, %21 : vector<32x128xf32>
      %23 = vector.extract_strided_slice %22 {offsets = [0, 0], sizes = [16, 128], strides = [1, 1]} : vector<32x128xf32> to vector<16x128xf32>
      %24 = arith.mulf %23, %23 : vector<16x128xf32>
      %cst = arith.constant dense<0.000000e+00> : vector<16xf32>
      %25 = vector.multi_reduction <add>, %24, %cst [1] : vector<16x128xf32> to vector<16xf32>
      %26 = vector.shape_cast %25 : vector<16xf32> to vector<16x1xf32>
      %cst_13 = arith.constant 1.000000e-24 : f32
      %27 = vector.broadcast %cst_13 : f32 to vector<16x1xf32>
      %28 = arith.maximumf %26, %27 : vector<16x1xf32>
      %29 = math.rsqrt %28 : vector<16x1xf32>
      %cst_14 = arith.constant 2.000000e+00 : f32
      %30 = vector.broadcast %cst_14 : f32 to vector<16x1xf32>
      %31 = arith.mulf %29, %30 : vector<16x1xf32>
      %32 = vector.broadcast %31 : vector<16x1xf32> to vector<16x128xf32>
      %33 = arith.mulf %23, %32 : vector<16x128xf32>
      %34 = arith.truncf %33 : vector<16x128xf32> to vector<16x128xbf16>
      %35 = vector.extract_strided_slice %22 {offsets = [16, 0], sizes = [16, 128], strides = [1, 1]} : vector<32x128xf32> to vector<16x128xf32>
      %36 = arith.mulf %35, %35 : vector<16x128xf32>
      %cst_15 = arith.constant dense<0.000000e+00> : vector<16xf32>
      %37 = vector.multi_reduction <add>, %36, %cst_15 [1] : vector<16x128xf32> to vector<16xf32>
      %38 = vector.shape_cast %37 : vector<16xf32> to vector<16x1xf32>
      %cst_16 = arith.constant 1.000000e-24 : f32
      %39 = vector.broadcast %cst_16 : f32 to vector<16x1xf32>
      %40 = arith.maximumf %38, %39 : vector<16x1xf32>
      %41 = math.rsqrt %40 : vector<16x1xf32>
      %cst_17 = arith.constant 1.000000e+00 : f32
      %42 = vector.broadcast %cst_17 : f32 to vector<16x1xf32>
      %43 = arith.mulf %41, %42 : vector<16x1xf32>
      %44 = vector.broadcast %43 : vector<16x1xf32> to vector<16x128xf32>
      %45 = arith.mulf %35, %44 : vector<16x128xf32>
      %46 = arith.truncf %45 : vector<16x128xf32> to vector<16x128xbf16>
      %cst_18 = arith.constant dense<0.000000e+00> : vector<16x16xf32>
      %47 = tpu.matmul %34, %46, %cst_18 {dimension_numbers = #tpu.dot_dimension_numbers<[1], [1], [0], [0], [0, 0, 1, 0], [], []>} : vector<16x128xbf16>, vector<16x128xbf16>, vector<16x16xf32> -> vector<16x16xf32>
      %48 = arith.extf %34 : vector<16x128xbf16> to vector<16x128xf32>
      %49 = arith.extf %46 : vector<16x128xbf16> to vector<16x128xf32>
      %50 = arith.mulf %48, %49 : vector<16x128xf32>
      %cst_19 = arith.constant dense<0.000000e+00> : vector<16xf32>
      %51 = vector.multi_reduction <add>, %50, %cst_19 [1] : vector<16x128xf32> to vector<16xf32>
      %52 = vector.shape_cast %51 : vector<16xf32> to vector<16x1xf32>
      %53 = tpu.iota {dimensions = array<i32: 0>} : vector<16x1xi32>
      %c8_i32 = arith.constant 8 : i32
      %54 = vector.broadcast %c8_i32 : i32 to vector<16x1xi32>
      %55 = arith.cmpi slt, %53, %54 : vector<16x1xi32>
      %56 = tpu.iota {dimensions = array<i32: 1>} : vector<1x16xi32>
      %c8_i32_20 = arith.constant 8 : i32
      %57 = vector.broadcast %c8_i32_20 : i32 to vector<1x16xi32>
      %58 = arith.cmpi slt, %56, %57 : vector<1x16xi32>
      %59 = vector.broadcast %55 : vector<16x1xi1> to vector<16x16xi1>
      %60 = vector.broadcast %58 : vector<1x16xi1> to vector<16x16xi1>
      %61 = arith.andi %59, %60 : vector<16x16xi1>
      %cst_21 = arith.constant -1.000000e+30 : f32
      %62 = vector.broadcast %cst_21 : f32 to vector<16x16xf32>
      %63 = arith.select %61, %47, %62 : vector<16x16xi1>, vector<16x16xf32>
      %cst_22 = arith.constant dense<0xFF800000> : vector<16xf32>
      %64 = vector.multi_reduction <maximumf>, %63, %cst_22 [1] : vector<16x16xf32> to vector<16xf32>
      %65 = vector.shape_cast %64 : vector<16xf32> to vector<16x1xf32>
      %66 = vector.broadcast %65 : vector<16x1xf32> to vector<16x16xf32>
      %67 = arith.subf %63, %66 : vector<16x16xf32>
      %68 = math.exp %67 : vector<16x16xf32>
      %cst_23 = arith.constant dense<0.000000e+00> : vector<16xf32>
      %69 = vector.multi_reduction <add>, %68, %cst_23 [1] : vector<16x16xf32> to vector<16xf32>
      %70 = vector.shape_cast %69 : vector<16xf32> to vector<16x1xf32>
      %71 = math.log %70 : vector<16x1xf32>
      %72 = arith.addf %65, %71 : vector<16x1xf32>
      %cst_24 = arith.constant dense<0xFF800000> : vector<16xf32>
      %73 = vector.multi_reduction <maximumf>, %63, %cst_24 [0] : vector<16x16xf32> to vector<16xf32>
      %74 = vector.shape_cast %73 : vector<16xf32> to vector<1x16xf32>
      %75 = vector.broadcast %74 : vector<1x16xf32> to vector<16x16xf32>
      %76 = arith.subf %63, %75 : vector<16x16xf32>
      %77 = math.exp %76 : vector<16x16xf32>
      %cst_25 = arith.constant dense<0.000000e+00> : vector<16xf32>
      %78 = vector.multi_reduction <add>, %77, %cst_25 [0] : vector<16x16xf32> to vector<16xf32>
      %79 = vector.shape_cast %78 : vector<16xf32> to vector<1x16xf32>
      %80 = math.log %79 : vector<1x16xf32>
      %81 = arith.addf %74, %80 : vector<1x16xf32>
      %cst_26 = arith.constant 0.000000e+00 : f32
      %82 = vector.broadcast %cst_26 : f32 to vector<16x1xf32>
      %83 = arith.select %55, %72, %82 : vector<16x1xi1>, vector<16x1xf32>
      %cst_27 = arith.constant 0.000000e+00 : f32
      %84 = vector.broadcast %cst_27 : f32 to vector<1x16xf32>
      %85 = arith.select %58, %81, %84 : vector<1x16xi1>, vector<1x16xf32>
      %cst_28 = arith.constant 0.000000e+00 : f32
      %86 = vector.broadcast %cst_28 : f32 to vector<16x1xf32>
      %87 = arith.select %55, %52, %86 : vector<16x1xi1>, vector<16x1xf32>
      %88 = vector.shape_cast %83 : vector<16x1xf32> to vector<1x16x1xf32>
      %cst_29 = arith.constant dense<0.000000e+00> : vector<1xf32>
      %89 = vector.multi_reduction <add>, %88, %cst_29 [1, 2] : vector<1x16x1xf32> to vector<1xf32>
      %90 = vector.shape_cast %89 : vector<1xf32> to vector<1x1x1xf32>
      %91 = vector.extract %90[0, 0, 0] : f32 from vector<1x1x1xf32>
      %92 = vector.shape_cast %85 : vector<1x16xf32> to vector<1x1x16xf32>
      %cst_30 = arith.constant dense<0.000000e+00> : vector<1xf32>
      %93 = vector.multi_reduction <add>, %92, %cst_30 [1, 2] : vector<1x1x16xf32> to vector<1xf32>
      %94 = vector.shape_cast %93 : vector<1xf32> to vector<1x1x1xf32>
      %95 = vector.extract %94[0, 0, 0] : f32 from vector<1x1x1xf32>
      %96 = arith.addf %91, %95 : f32
      %97 = vector.shape_cast %87 : vector<16x1xf32> to vector<1x16x1xf32>
      %cst_31 = arith.constant dense<0.000000e+00> : vector<1xf32>
      %98 = vector.multi_reduction <add>, %97, %cst_31 [1, 2] : vector<1x16x1xf32> to vector<1xf32>
      %99 = vector.shape_cast %98 : vector<1xf32> to vector<1x1x1xf32>
      %100 = vector.extract %99[0, 0, 0] : f32 from vector<1x1x1xf32>
      %cst_32 = arith.constant 2.000000e+00 : f32
      %101 = arith.mulf %cst_32, %100 : f32
      %102 = arith.subf %96, %101 : f32
      %cst_33 = arith.constant 6.250000e-02 : f32
      %103 = arith.mulf %cst_33, %102 : f32
      %104 = vector.broadcast %103 : f32 to vector<1x128xf32>
      %c0_34 = arith.constant 0 : index
      %c0_35 = arith.constant 0 : index
      %105 = vector.load %arg8[%c0_34, %c0_35] : memref<1x128xf32, #tpu.memory_space<vmem>>, vector<1x128xf32>
      tpu.vector_store %arg8[%c0_34, %c0_35], %104 {strides = array<i32>} : memref<1x128xf32, #tpu.memory_space<vmem>>, vector<1x128xf32>,
    } else {
    }
    return
  }
  func.func @transform_0(%arg0: i32, %arg1: i32) -> (i32, i32) {
    %c1_i32 = arith.constant 1 : i32
    %0 = arith.subi %c1_i32, %arg0 : i32
    %1 = arith.muli %arg1, %0 : i32
    %c0_i32 = arith.constant 0 : i32
    %2 = arith.muli %c0_i32, %arg0 : i32
    %3 = arith.addi %1, %2 : i32
    %c0_i32_0 = arith.constant 0 : i32
    %c0_i32_1 = arith.constant 0 : i32
    return %c0_i32_0, %3 : i32, i32
  }
  func.func @transform_1(%arg0: i32, %arg1: i32) -> (i32, i32) {
    %c1_i32 = arith.constant 1 : i32
    %0 = arith.subi %c1_i32, %arg0 : i32
    %1 = arith.muli %arg1, %0 : i32
    %c0_i32 = arith.constant 0 : i32
    %2 = arith.muli %c0_i32, %arg0 : i32
    %3 = arith.addi %1, %2 : i32
    %c0_i32_0 = arith.constant 0 : i32
    %c0_i32_1 = arith.constant 0 : i32
    return %c0_i32_0, %3 : i32, i32
  }
  func.func @transform_2(%arg0: i32, %arg1: i32) -> (i32, i32) {
    %c1_i32 = arith.constant 1 : i32
    %0 = arith.subi %c1_i32, %arg0 : i32
    %1 = arith.muli %arg1, %0 : i32
    %c0_i32 = arith.constant 0 : i32
    %2 = arith.muli %c0_i32, %arg0 : i32
    %3 = arith.addi %1, %2 : i32
    %c0_i32_0 = arith.constant 0 : i32
    %c0_i32_1 = arith.constant 0 : i32
    return %c0_i32_0, %3 : i32, i32
  }
  func.func @transform_3(%arg0: i32, %arg1: i32) -> (i32, i32) {
    %0 = arith.muli %arg1, %arg0 : i32
    %c0_i32 = arith.constant 0 : i32
    %c0_i32_0 = arith.constant 0 : i32
    return %c0_i32, %0 : i32, i32
  }
  func.func @transform_4(%arg0: i32, %arg1: i32) -> (i32, i32) {
    %c0_i32 = arith.constant 0 : i32
    %c0_i32_0 = arith.constant 0 : i32
    %c0_i32_1 = arith.constant 0 : i32
    return %c0_i32, %c0_i32_0 : i32, i32
  }
  func.func @transform_5(%arg0: i32, %arg1: i32) -> (i32, i32) {
    %c0_i32 = arith.constant 0 : i32
    %c0_i32_0 = arith.constant 0 : i32
    %c0_i32_1 = arith.constant 0 : i32
    return %c0_i32, %c0_i32_0 : i32, i32
  }
  func.func @transform_6(%arg0: i32, %arg1: i32) -> (i32, i32) {
    %c0_i32 = arith.constant 0 : i32
    %c0_i32_0 = arith.constant 0 : i32
    %c0_i32_1 = arith.constant 0 : i32
    return %c0_i32, %c0_i32_0 : i32, i32
  }
}

</mosaic_0001>

<bundles_post_ra>
// kernel: tpu_custom_call.1
= control target key start
LH: loop header
LB: loop body
LE: loop exit
PB: predicated region body
PF: predicated region fallthrough
CT: control target
= control target key end

     0   :  { %11 = vsyncpa [#allocation5], 0  ;;  %s1649_s0 = inlined_call_operand.hbm [shape: bf16[16,128], index: 0, kind: input, shape index: {}]   ;;  %s1650_s1 = inlined_call_operand.hbm [shape: bf16[16,128], index: 1, kind: input, shape index: {}]   ;;  %s1651_s2 = inlined_call_operand.hbm [shape: bf16[128,128], index: 2, kind: input, shape index: {}]   ;;  %s1652_s3 = inlined_call_operand.hbm [shape: bf16[128,128], index: 3, kind: input, shape index: {}]   ;;  %s1653_s4 = inlined_call_operand.vmem [shape: f32[1,128], index: 4, kind: input, shape index: {}]   ;;  %s1654_s5 = inlined_call_operand.vmem [shape: f32[1,128], index: 5, kind: input, shape index: {}]   ;;  %s1655_s6 = inlined_call_operand.hbm [shape: f32[1,128], index: 6, kind: output, shape index: {}]  }
   0x1   :  { %13 = vsyncpa [#allocation5 + $0x1], 0 }
   0x2   :  { %14 = vsyncpa [#allocation8], 0 }
   0x3   :  { %16 = vsyncpa [#allocation8 + $0x1], 0 }
   0x4   :  { %17 = vsyncpa [#allocation11], 0 }
   0x5   :  { %19 = vsyncpa [#allocation11 + $0x1], 0 }
   0x6   :  { %20 = vsyncpa [#allocation6], 0  ;;  %s1545_s21 = smov 0   ;;  %s1547_s22 = smov 0  }
   0x7   :  { %s1549_s23 = smov 0  }
   0x8 LB: > { %s1561_s24 = sadd.s32 4294967295, %s1499_s23   ;;  %p1249_p0 = scmp.lt.s32.totalorder %s1499_s23, 2  ;;  %s1499_s23 = sphi %s1549_s23, %s26_s23   ;;  %s1495_s22 = sphi %s1547_s22, %s1659_s22   ;;  %s1491_s21 = sphi %s1545_s21, %s1658_s21  }
   0x9   : > { %p1250_p1 = scmp.eq.s32.totalorder %s1499_s23, 0  ;;  %s266_s25 = sand.u32 1, %s1499_s23  }
   0xa   : > { %s277_s28 = sshll.u32 %s1650_s1, 4  ;;  %p1076_p3 = scmp.ge.s32.totalorder %s1499_s23, 1  ;;  %s278_s28 = int_to_ptr.hbm [resolvable:$true] %s277_s28 }
   0xb   : > { %p1569_p2 = pnand %p1250_p1, %p1249_p0  ;;  %s1501_s30 = smov [#allocation7]  }
   0xc   : > { %s279_s7 = sshll.u32 %s1501_s30, 4  ;;  %p332_p4 = scmp.lt.s32.totalorder %s1499_s23, 3  ;;  %s280_s7 = int_to_ptr.vmem [resolvable:$true] %s279_s7 }
   0xd   : > { %s267_s8 = scalar_lea.sflag [#allocation8], %s266_s25  ;;  %s1502_s9 = smov 64  }
   0xe   : > { %s1503_s10 = smov 4   ;;  %p1577_p5 = pnand %p1076_p3, %p332_p4 }
   0xf   : > { %1242 = dma.hbm_to_vmem [thread:$0]  (!%p1569_p2), %s278_s28, 128, %s280_s7, %s267_s8, %s1502_s9, %s1502_s9, %s1503_s10  }
  0x10   : > { %s254_s14 = sshll.u32 %s1649_s0, 4  ;;  %s38_s15 = sadd.s32 1, %s1495_s22  ;;  %s255_s14 = int_to_ptr.hbm [resolvable:$true] %s254_s14 }
  0x11   : > { %p40_p6 = scmp.ge.s32.totalorder %s38_s15, 2  ;;  %s1504_s16 = smov [#allocation4]  }
  0x12   : > { %s256_s17 = sshll.u32 %s1504_s16, 4  ;;  %s300_s20 = sshll.u32 %s1651_s2, 4  ;;  %s257_s17 = int_to_ptr.vmem [resolvable:$true] %s256_s17  ;;  %s301_s20 = int_to_ptr.hbm [resolvable:$true] %s300_s20 }
  0x13   : > { %s1661_s15 = smov (%p40_p6, %s38_s15), 0  ;;  %s322_s27 = sshll.u32 %s1652_s3, 4  ;;  %s323_s27 = int_to_ptr.hbm [resolvable:$true] %s322_s27 }
  0x14   : > { %1239 = dma.hbm_to_vmem [thread:$0]  (!%p1569_p2), %s255_s14, 128, %s257_s17, [#allocation5], %s1502_s9, %s1502_s9, %s1503_s10  }
  0x15   : > { %s1505_s28 = smov [#allocation9]   ;;  %s1506_s7 = smov [#allocation10]  }
  0x16   : > { %s302_s30 = sshll.u32 %s1505_s28, 4  ;;  %s324_s12 = sshll.u32 %s1506_s7, 4  ;;  %s303_s30 = int_to_ptr.vmem [resolvable:$true] %s302_s30  ;;  %s325_s12 = int_to_ptr.vmem [resolvable:$true] %s324_s12 }
  0x17   : > { %1245 = dma.hbm_to_vmem [thread:$0]  (!%p1569_p2), %s301_s20, 1024, %s303_s30, %s267_s8, %s1502_s9, %s1502_s9, %s1503_s10  }
  0x18   : > { %1248 = dma.hbm_to_vmem [thread:$0]  (!%p1569_p2), %s323_s27, 1024, %s325_s12, [#allocation11], %s1502_s9, %s1502_s9, %s1503_s10  }
  0x19   : > { %336 = sbr.rel (%p1577_p5) target bundleno = 1210 (0x4ba), region = 44  ;;  %p1254_p7 = scmp.eq.s32.totalorder (!%p1577_p5), %s1561_s24, 0 }
  0x1e   : > { %1474 = dma.done.wait (%p1254_p7), [#allocation5], 128  }
  0x1f   : > { %1476 = vsyncadd (%p1254_p7), [#allocation5], 4294967168  ;;  %s348_s13 = sand.u32 1, %s1561_s24  }
  0x20   : > { %s349_s14 = scalar_lea.sflag [#allocation8], %s348_s13 }
  0x21   : > { %1478 = dma.done.wait (%p1254_p7), %s349_s14, 1152  }
  0x22   : > { %1480 = vsyncadd (%p1254_p7), %s349_s14, 4294966144 }
  0x23   : > { %1482 = dma.done.wait (%p1254_p7), [#allocation11], 1024  }
  0x24   : > { %1484 = vsyncadd (%p1254_p7), [#allocation11], 4294966272  ;;  %p428_p8 = scmp.eq.s32.totalorder %s1491_s21, 0  ;;  %v1507_v0 = vmov 0.0   ;;  %p1081_p9 = scmp.ne.s32.totalorder %s1491_s21, 0 }
  0x25   : > { %424 = vst [vmem:[#allocation3 + $0x8] sm:$0xff] %v1507_v0 }
  0x26   : > { %425 = vst [vmem:[#allocation3 + $0x10] sm:$0xff] %v1507_v0  ;;  %431 = sbr.rel (%p1081_p9) target bundleno = 245 (0xf5), region = 68 }
  0x27   : > { %426 = vst [vmem:[#allocation3] sm:$0xff] %v1507_v0 }
  0x28   : > { %427 = vst [vmem:[#allocation3 + $0x18] sm:$0xff] %v1507_v0 }
  0x2b   : > { %v1176_v1 = vld [vmem:[#allocation9 + $0x38] sm:$0xff]  ;;  %v1175_v2 = vld [vmem:[#allocation9 + $0x30] sm:$0xff]  ;;  %v1174_v3 = vld [vmem:[#allocation9 + $0x28] sm:$0xff] }
  0x2c   : > { %506 = vmatpush.bf16.xpose.msra.mxu0 %v1176_v1  ;;  %534 = vmatpush.bf16.xpose.msra.mxu1 %v1176_v1  ;;  %v1173_v4 = vld [vmem:[#allocation9 + $0x20] sm:$0xff]  ;;  %v1172_v5 = vld [vmem:[#allocation9 + $0x18] sm:$0xff]  ;;  %v1171_v6 = vld [vmem:[#allocation9 + $0x10] sm:$0xff] }
  0x2d   : > { %v1170_v7 = vld [vmem:[#allocation9 + $0x8] sm:$0xff]  ;;  %v1169_v8 = vld [vmem:[#allocation9] sm:$0xff]  ;;  %v1178_v10 = vld [vmem:[#allocation7] sm:$0xff] }
  0x2e   : > { %v1177_v9 = vld [vmem:[#allocation4] sm:$0xff]  ;;  %v448_v11 = vld [vmem:[#allocation3 + $0x8] sm:$0xff]  ;;  %v449_v17 = vld [vmem:[#allocation3 + $0x10] sm:$0xff] }
  0x2f   : > { %v524_v12 = vld [vmem:[#allocation3] sm:$0xff]  ;;  %v525_v18 = vld [vmem:[#allocation3 + $0x18] sm:$0xff] }
  0x34   : > { %507 = vmatpush.bf16.xpose.msra.mxu0 %v1175_v2  ;;  %535 = vmatpush.bf16.xpose.msra.mxu1 %v1175_v2 }
  0x3c   : > { %508 = vmatpush.bf16.xpose.msra.mxu0 %v1174_v3  ;;  %536 = vmatpush.bf16.xpose.msra.mxu1 %v1174_v3 }
  0x44   : > { %509 = vmatpush.bf16.xpose.msra.mxu0 %v1173_v4  ;;  %537 = vmatpush.bf16.xpose.msra.mxu1 %v1173_v4 }
  0x4c   : > { %510 = vmatpush.bf16.xpose.msra.mxu0 %v1172_v5  ;;  %538 = vmatpush.bf16.xpose.msra.mxu1 %v1172_v5 }
  0x54   : > { %511 = vmatpush.bf16.xpose.msra.mxu0 %v1171_v6  ;;  %539 = vmatpush.bf16.xpose.msra.mxu1 %v1171_v6 }
  0x5c   : > { %512 = vmatpush.bf16.xpose.msra.mxu0 %v1170_v7  ;;  %540 = vmatpush.bf16.xpose.msra.mxu1 %v1170_v7 }
  0x64   : > { %513 = vmatpush.bf16.xpose.msra.mxu0 %v1169_v8  ;;  %541 = vmatpush.bf16.xpose.msra.mxu1 %v1169_v8 }
  0x6b   : > { %514 = vmatmul.bf16.vlgmr.msra.gmra.mxu0 %v1177_v9  ;;  %542 = vmatmul.bf16.vlgmr.msra.gmra.mxu1 %v1178_v10 }
  0xe8   : > { %v515_v13 = vpop.f32.mrf.mxu0  ;;  %v543_v14 = vpop.f32.mrf.mxu1 }
  0xe9   : > { %v520_v15 = vadd.f32 %v515_v13, %v448_v11  ;;  %v548_v16 = vadd.f32 %v543_v14, %v524_v12 }
  0xeb   : > { %522 = vst [vmem:[#allocation3 + $0x8] sm:$0xff] %v520_v15 }
  0xec   : > { %550 = vst [vmem:[#allocation3] sm:$0xff] %v548_v16 }
  0xf0   : > { %v517_v19 = vpop.f32.mrf.mxu0  ;;  %v545_v20 = vpop.f32.mrf.mxu1 }
  0xf1   : > { %v521_v21 = vadd.f32 %v517_v19, %v449_v17  ;;  %v549_v22 = vadd.f32 %v545_v20, %v525_v18 }
  0xf3   : > { %523 = vst [vmem:[#allocation3 + $0x10] sm:$0xff] %v521_v21 }
  0xf4   : > { %551 = vst [vmem:[#allocation3 + $0x18] sm:$0xff] %v549_v22 }
  0xf5 PF: > { %p552_p10 = scmp.eq.s32.totalorder %s1491_s21, 1  ;;  %p1122_p11 = scmp.ne.s32.totalorder %s1491_s21, 1 }
  0xf7   : > { %555 = sbr.rel (%p1122_p11) target bundleno = 454 (0x1c6), region = 72 }
  0xfc   : > { %v1188_v23 = vld [vmem:[#allocation10 + $0x38] sm:$0xff]  ;;  %v1187_v24 = vld [vmem:[#allocation10 + $0x30] sm:$0xff]  ;;  %v1186_v25 = vld [vmem:[#allocation10 + $0x28] sm:$0xff] }
  0xfd   : > { %645 = vmatpush.bf16.xpose.msra.mxu0 %v1188_v23  ;;  %1202 = vmatpush.bf16.xpose.msra.mxu1 %v1188_v23  ;;  %v1185_v26 = vld [vmem:[#allocation10 + $0x20] sm:$0xff]  ;;  %v1184_v27 = vld [vmem:[#allocation10 + $0x18] sm:$0xff]  ;;  %v1183_v28 = vld [vmem:[#allocation10 + $0x10] sm:$0xff] }
  0xfe   : > { %v1182_v29 = vld [vmem:[#allocation10 + $0x8] sm:$0xff]  ;;  %v1181_v30 = vld [vmem:[#allocation10] sm:$0xff]  ;;  %v1179_v31 = vld [vmem:[#allocation2] sm:$0xff] }
  0xff   : > { %v1180_v32 = vld [vmem:[#allocation2 + $0x8] sm:$0xff]  ;;  %v565_v33 = vld [vmem:[#allocation3 + $0x8] sm:$0xff]  ;;  %v567_v34 = vld [vmem:[#allocation3] sm:$0xff] }
 0x100   : > { %v566_v39 = vld [vmem:[#allocation3 + $0x10] sm:$0xff]  ;;  %v568_v40 = vld [vmem:[#allocation3 + $0x18] sm:$0xff] }
 0x105   : > { %646 = vmatpush.bf16.xpose.msra.mxu0 %v1187_v24  ;;  %1203 = vmatpush.bf16.xpose.msra.mxu1 %v1187_v24 }
 0x10d   : > { %647 = vmatpush.bf16.xpose.msra.mxu0 %v1186_v25  ;;  %1204 = vmatpush.bf16.xpose.msra.mxu1 %v1186_v25 }
 0x115   : > { %648 = vmatpush.bf16.xpose.msra.mxu0 %v1185_v26  ;;  %1205 = vmatpush.bf16.xpose.msra.mxu1 %v1185_v26 }
 0x11d   : > { %649 = vmatpush.bf16.xpose.msra.mxu0 %v1184_v27  ;;  %1206 = vmatpush.bf16.xpose.msra.mxu1 %v1184_v27 }
 0x125   : > { %650 = vmatpush.bf16.xpose.msra.mxu0 %v1183_v28  ;;  %1207 = vmatpush.bf16.xpose.msra.mxu1 %v1183_v28 }
 0x12d   : > { %651 = vmatpush.bf16.xpose.msra.mxu0 %v1182_v29  ;;  %1208 = vmatpush.bf16.xpose.msra.mxu1 %v1182_v29 }
 0x135   : > { %652 = vmatpush.bf16.xpose.msra.mxu0 %v1181_v30  ;;  %1209 = vmatpush.bf16.xpose.msra.mxu1 %v1181_v30 }
 0x13c   : > { %653 = vmatmul.bf16.vlgmr.msra.gmra.mxu0 %v1179_v31  ;;  %658 = vmatmul.bf16.vlgmr.msra.gmra.mxu1 %v1180_v32 }
 0x1b9   : > { %v654_v35 = vpop.f32.mrf.mxu0  ;;  %v659_v36 = vpop.f32.mrf.mxu1 }
 0x1ba   : > { %v664_v37 = vadd.f32 %v654_v35, %v565_v33  ;;  %v666_v38 = vadd.f32 %v659_v36, %v567_v34 }
 0x1bc   : > { %668 = vst [vmem:[#allocation3 + $0x8] sm:$0xff] %v664_v37 }
 0x1bd   : > { %670 = vst [vmem:[#allocation3] sm:$0xff] %v666_v38 }
 0x1c1   : > { %v656_v41 = vpop.f32.mrf.mxu0  ;;  %v661_v42 = vpop.f32.mrf.mxu1 }
 0x1c2   : > { %v665_v43 = vadd.f32 %v656_v41, %v566_v39  ;;  %v667_v44 = vadd.f32 %v661_v42, %v568_v40 }
 0x1c4   : > { %669 = vst [vmem:[#allocation3 + $0x10] sm:$0xff] %v665_v43 }
 0x1c5   : > { %671 = vst [vmem:[#allocation3 + $0x18] sm:$0xff] %v667_v44 }
 0x1c6 PF: > { %675 = sbr.rel (!%p428_p8) target bundleno = 468 (0x1d4), region = 76  ;;  %v676_v45 = vld [vmem:[#allocation3 + $0x8] sm:$0xff] (%p428_p8)  ;;  %v1293_v47 = vld [vmem:[%s1653_s4] ss:$0 sm:$0xff] (%p428_p8)  ;;  %v678_v48 = vld [vmem:[#allocation3] sm:$0xff] (%p428_p8) }
 0x1c7   : > { %v684_v50 = vadd.f32 (%p428_p8), %v1293_v47, %v676_v45  ;;  %v686_v52 = vadd.f32 (%p428_p8), %v1293_v47, %v678_v48 }
 0x1c9   : > { %v688_v54 = vmax.f32 (%p428_p8), %v684_v50, 0.0  ;;  %v690_v56 = vmax.f32 (%p428_p8), %v686_v52, 0.0 }
 0x1cb   : > { %v677_v46 = vld [vmem:[#allocation3 + $0x10] sm:$0xff] }
 0x1cc   : > { %v679_v49 = vld [vmem:[#allocation3 + $0x18] sm:$0xff]  ;;  %v685_v51 = vadd.f32 %v1293_v47, %v677_v46 }
 0x1cd   : > { %v687_v53 = vadd.f32 %v1293_v47, %v679_v49 }
 0x1ce   : > { %v689_v55 = vmax.f32 %v685_v51, 0.0 }
 0x1cf   : > { %v691_v57 = vmax.f32 %v687_v53, 0.0 }
 0x1d0   : > { %v1194_v58 = vpack.c.bf16 %v689_v55, %v688_v54 }
 0x1d1   : > { %v1199_v59 = vpack.c.bf16 %v691_v57, %v690_v56 }
 0x1d2   : > { %1195 = vst [vmem:[#allocation2] sm:$0xff] %v1194_v58  }
 0x1d3   : > { %1201 = vst [vmem:[#allocation2 + $0x8] sm:$0xff] %v1199_v59  }
 0x1d4 PF: > { %703 = sbr.rel (!%p552_p10) target bundleno = 1204 (0x4b4), region = 80  ;;  %v706_v60 = vld [vmem:[#allocation3] sm:$0xff] (%p552_p10)  ;;  %v1294_v61 = vld [vmem:[%s1654_s5] ss:$0 sm:$0xff] (%p552_p10)  ;;  %v704_v62 = vld [vmem:[#allocation3 + $0x8] sm:$0xff] (%p552_p10)  ;;  %vm891_vm12 = vcmask (%p552_p10), 7168  }
 0x1d5   : > { %v714_v63 = vadd.f32 (%p552_p10), %v1294_v61, %v706_v60  ;;  %v712_v0 = vadd.f32 (%p552_p10), %v1294_v61, %v704_v62  ;;  %v707_v1 = vld [vmem:[#allocation3 + $0x18] sm:$0xff] (%p552_p10)  ;;  %v705_v2 = vld [vmem:[#allocation3 + $0x10] sm:$0xff] (%p552_p10)  ;;  %vm836_vm13 = vcmask (%p552_p10), 130048   ;;  %vm904_vm15 = vcmask (%p552_p10), 122880  }
 0x1d6   : > { %v1617_v5 = vadd.f32 (%p552_p10), %v1294_v61, %v707_v1  ;;  %v1619_v6 = vadd.f32 (%p552_p10), %v1294_v61, %v705_v2  ;;  %v823_v2 = vlaneseq (%p552_p10) }
 0x1d7   : > { %v750_v3 = vmul.f32 (%p552_p10), %v714_v63, %v714_v63  ;;  %v716_v4 = vmul.f32 (%p552_p10), %v712_v0, %v712_v0 }
 0x1d8   : > { %v751_v7 = vmul.f32 (%p552_p10), %v1617_v5, %v1617_v5  ;;  %v717_v8 = vmul.f32 (%p552_p10), %v1619_v6, %v1619_v6 }
 0x1d9   : > { %752 = vadd.xlane.f32.xlu0 %v750_v3  ;;  %718 = vadd.xlane.f32.xlu1 %v716_v4  ;;  %v824_v3 = vand.u32 127, %v823_v2 }
 0x1db   : > { %vm825_vm14 = vcmp.lt.s32.totalorder %v824_v3, 8 }
 0x1e1   : > { %754 = vadd.xlane.f32.xlu0 %v751_v7  ;;  %720 = vadd.xlane.f32.xlu1 %v717_v8 }
 0x24c   : > { %v753_v9 = vpop.xlane.xlu0 %752  ;;  %v719_v10 = vpop.xlane.xlu1 %718 }
 0x24d   : > { %v756_v11 = vmax.f32 %v753_v9, 1e-24  ;;  %v722_v12 = vmax.f32 %v719_v10, 1e-24 }
 0x24f   : > { %1295 = vrsqrt.f32 %v756_v11  ;;  %vm764_vm2 = vweird.f32 %v756_v11  ;;  %vm730_vm4 = vweird.f32 %v722_v12 }
 0x250   : > { %1297 = vrsqrt.f32 %v722_v12 }
 0x254   : > { %v755_v13 = vpop.xlane.xlu0 %754  ;;  %v721_v14 = vpop.xlane.xlu1 %720 }
 0x255   : > { %v1296_v15 = vpop.eup %1295  ;;  %v757_v16 = vmax.f32 %v755_v13, 1e-24  ;;  %v723_v17 = vmax.f32 %v721_v14, 1e-24 }
 0x256   : > { %v1298_v18 = vpop.eup %1297  ;;  %v759_v19 = vmul.f32 %v1296_v15, %v756_v11  ;;  %vm765_vm0 = vweird.f32 %v1296_v15 }
 0x257   : > { %v725_v20 = vmul.f32 %v1298_v18, %v722_v12  ;;  %1299 = vrsqrt.f32 %v757_v16  ;;  %vm731_vm1 = vweird.f32 %v1298_v18  ;;  %vm766_vm3 = vmor %vm764_vm2, %vm765_vm0  ;;  %vm774_vm8 = vweird.f32 %v757_v16 }
 0x258   : > { %v760_v21 = vmul.f32 %v1296_v15, %v759_v19  ;;  %1301 = vrsqrt.f32 %v723_v17  ;;  %vm732_vm5 = vmor %vm730_vm4, %vm731_vm1  ;;  %vm740_vm10 = vweird.f32 %v723_v17 }
 0x259   : > { %v726_v22 = vmul.f32 %v1298_v18, %v725_v20 }
 0x25a   : > { %v761_v23 = vmul.f32 0.5, %v760_v21 }
 0x25b   : > { %v727_v24 = vmul.f32 0.5, %v726_v22 }
 0x25c   : > { %v762_v25 = vsub.f32 1.5, %v761_v23 }
 0x25d   : > { %v1300_v26 = vpop.eup %1299  ;;  %v728_v27 = vsub.f32 1.5, %v727_v24 }
 0x25e   : > { %v1302_v28 = vpop.eup %1301  ;;  %v763_v29 = vmul.f32 %v1296_v15, %v762_v25  ;;  %v769_v30 = vmul.f32 %v1300_v26, %v757_v16  ;;  %vm775_vm6 = vweird.f32 %v1300_v26 }
 0x25f   : > { %v729_v31 = vmul.f32 %v1298_v18, %v728_v27  ;;  %v735_v32 = vmul.f32 %v1302_v28, %v723_v17  ;;  %vm741_vm7 = vweird.f32 %v1302_v28  ;;  %vm776_vm9 = vmor %vm774_vm8, %vm775_vm6 }
 0x260   : > { %v770_v33 = vmul.f32 %v1300_v26, %v769_v30  ;;  %v767_v34 = vsel %vm766_vm3, %v1296_v15, %v763_v29  ;;  %vm742_vm11 = vmor %vm740_vm10, %vm741_vm7 }
 0x261   : > { %v736_v35 = vmul.f32 %v1302_v28, %v735_v32  ;;  %v733_v36 = vsel %vm732_vm5, %v1298_v18, %v729_v31  ;;  %v778_v37 = vmul.f32 %v767_v34, %v714_v63 }
 0x262   : > { %v771_v38 = vmul.f32 0.5, %v770_v33  ;;  %v744_v39 = vmul.f32 2.0, %v733_v36 }
 0x263   : > { %v737_v40 = vmul.f32 0.5, %v736_v35  ;;  %v780_v43 = vpack.c.bf16 %v778_v37, %v778_v37 }
 0x264   : > { %v772_v41 = vsub.f32 1.5, %v771_v38  ;;  %v746_v42 = vmul.f32 %v744_v39, %v712_v0 }
 0x265   : > { %v738_v44 = vsub.f32 1.5, %v737_v40  ;;  %v810_v49 = vunpack.c.l.bf16 %v780_v43  ;;  %v790_v57 = vunpack.c.l.b16 %v780_v43 }
 0x266   : > { %v748_v45 = vpack.c.bf16 %v746_v42, %v746_v42  ;;  %v773_v46 = vmul.f32 %v1300_v26, %v772_v41 }
 0x267   : > { %v739_v47 = vmul.f32 %v1302_v28, %v738_v44 }
 0x268   : > { %v808_v48 = vunpack.c.l.bf16 %v748_v45  ;;  %v777_v50 = vsel %vm776_vm9, %v1300_v26, %v773_v46  ;;  %v784_v62 = vunpack.c.l.b16 %v748_v45 }
 0x269   : > { %v779_v51 = vmul.f32 %v777_v50, %v1617_v5  ;;  %v743_v52 = vsel %vm742_vm11, %v1302_v28, %v739_v47  ;;  %v1508_v5 = vmov -inf  }
 0x26a   : > { %v812_v53 = vmul.f32 %v810_v49, %v808_v48  ;;  %v745_v54 = vmul.f32 2.0, %v743_v52 }
 0x26b   : > { %v781_v55 = vpack.c.bf16 %v779_v51, %v779_v51 }
 0x26c   : > { %814 = vadd.xlane.f32.xlu0 %v812_v53  ;;  %v747_v56 = vmul.f32 %v745_v54, %v1619_v6  ;;  %v840_v6 = vsel %vm836_vm13, -1e+30, %v1508_v5 }
 0x26d   : > { %v791_v58 = vunpack.c.l.b16 %v781_v55 }
 0x26e   : > { %v749_v59 = vpack.c.bf16 %v747_v56, %v747_v56 }
 0x26f   : > { %v792_v60 = vpack.c.b16 %v791_v58, %v790_v57 }
 0x270   : > { %v785_v61 = vunpack.c.l.b16 %v749_v59 }
 0x271   : > { %801 = vmatpush.bf16.xpose.msra.mxu0 %v792_v60 }
 0x272   : > { %v786_v63 = vpack.c.b16 %v785_v61, %v784_v62 }
 0x278   : > { %802 = vmatmul.bf16.vlgmr.msra.gmra.mxu0 %v786_v63 }
 0x2df   : > { %v815_v0 = vpop.xlane.xlu0 %814 }
 0x2e0   : > { %v916_v1 = vsel %vm891_vm12, %v815_v0, 0.0 }
 0x2e1   : > { %919 = vadd.xlane.f32.xlu0 %v916_v1 }
 0x2f5   : > { %v803_v4 = vpop.f32.mrf.mxu0 }
 0x2f6   : > { %v834_v7 = vsel %vm825_vm14, %v803_v4, -1e+30 }
 0x2f7   : > { %v837_v8 = vsel %vm836_vm13, %v834_v7, -inf }
 0x2f8   : > { %838 = vmax.xlane.f32.xlu2 %v837_v8  ;;  %v861_v9 = vmax.f32 %v837_v8, %v840_v6 }
 0x2fa   : > { %v862_v10 = vrot.slane %v861_v9, 4 }
 0x2fc   : > { %v863_v11 = vmax.f32 %v861_v9, %v862_v10 }
 0x2fd   : > { %v805_v12 = vpop.f32.mrf.mxu0 }
 0x2fe   : > { %v864_v13 = vrot.slane %v863_v11, 2 }
 0x300   : > { %v865_v14 = vmax.f32 %v863_v11, %v864_v13 }
 0x302   : > { %v866_v15 = vrot.slane %v865_v14, 1 }
 0x304   : > { %v867_v16 = vmax.f32 %v865_v14, %v866_v15 }
 0x306   : > { %v868_v17 = vsub.f32 %v834_v7, %v867_v16  ;;  %v869_v18 = vsub.f32 -1e+30, %v867_v16 }
 0x308   : > { %v870_v19 = vmul.f32 1.442695, %v868_v17  ;;  %v872_v20 = vmul.f32 1.442695, %v869_v18 }
 0x30a   : > { %1303 = vpow2.f32 %v870_v19 }
 0x30b   : > { %1305 = vpow2.f32 %v872_v20 }
 0x310   : > { %v1304_v21 = vpop.eup %1303 }
 0x311   : > { %v1306_v22 = vpop.eup %1305  ;;  %v874_v23 = vsel %vm836_vm13, %v1304_v21, 0.0 }
 0x312   : > { %v875_v24 = vsel %vm836_vm13, %v1306_v22, 0.0 }
 0x313   : > { %v876_v25 = vadd.f32 %v875_v24, %v874_v23 }
 0x315   : > { %v877_v26 = vrot.slane %v876_v25, 4 }
 0x317   : > { %v878_v27 = vadd.f32 %v877_v26, %v876_v25 }
 0x319   : > { %v879_v28 = vrot.slane %v878_v27, 2 }
 0x31b   : > { %v880_v29 = vadd.f32 %v879_v28, %v878_v27 }
 0x31d   : > { %v881_v30 = vrot.slane %v880_v29, 1 }
 0x31f   : > { %v882_v31 = vadd.f32 %v881_v30, %v880_v29 }
 0x321   : > { %1307 = vlog2.f32 %v882_v31 }
 0x327   : > { %v1308_v32 = vpop.eup %1307 }
 0x328   : > { %v884_v33 = vmul.f32 0.6931472, %v1308_v32 }
 0x32a   : > { %v885_v34 = vadd.f32 %v884_v33, %v867_v16 }
 0x32c   : > { %v888_v35 = vsel %vm825_vm14, %v885_v34, 0.0 }
 0x32d   : > { %v905_v41 = vsel %vm904_vm15, %v888_v35, 0.0 }
 0x354   : > { %v920_v48 = vpop.xlane.xlu0 %919 }
 0x355   : > { %v921_v50 = vrot.slane %v920_v48, 4 }
 0x357   : > { %v922_v52 = vadd.f32 %v921_v50, %v920_v48 }
 0x359   : > { %v923_v55 = vrot.slane %v922_v52, 2 }
 0x35b   : > { %v924_v59 = vadd.f32 %v923_v55, %v922_v52 }
 0x35d   : > { %v925_v0 = vrot.slane %v924_v59, 1 }
 0x35f   : > { %v926_v3 = vadd.f32 %v925_v0, %v924_v59 }
 0x36b   : > { %v839_v36 = vpop.xlane.xlu2 %838 }
 0x36c   : > { %v843_v37 = vsub.f32 %v834_v7, %v839_v36 }
 0x36e   : > { %v845_v38 = vmul.f32 1.442695, %v843_v37 }
 0x370   : > { %1309 = vpow2.f32 %v845_v38 }
 0x376   : > { %v1310_v39 = vpop.eup %1309 }
 0x377   : > { %v849_v40 = vsel %vm836_vm13, %v1310_v39, 0.0 }
 0x378   : > { %850 = vadd.xlane.f32.xlu2 %v849_v40 }
 0x380   : > { %906 = vadd.xlane.f32.xlu2 %v905_v41 }
 0x3eb   : > { %v851_v42 = vpop.xlane.xlu2 %850 }
 0x3ec   : > { %1311 = vlog2.f32 %v851_v42 }
 0x3f2   : > { %v1312_v43 = vpop.eup %1311 }
 0x3f3   : > { %v856_v44 = vmul.f32 0.6931472, %v1312_v43  ;;  %v907_v47 = vpop.xlane.xlu2 %906 }
 0x3f4   : > { %v908_v49 = vrot.slane %v907_v47, 4 }
 0x3f5   : > { %v859_v45 = vadd.f32 %v856_v44, %v839_v36 }
 0x3f6   : > { %v909_v51 = vadd.f32 %v908_v49, %v907_v47 }
 0x3f7   : > { %v892_v46 = vsel %vm891_vm12, %v859_v45, 0.0 }
 0x3f8   : > { %895 = vadd.xlane.f32.xlu1 %v892_v46  ;;  %v910_v53 = vrot.slane %v909_v51, 2 }
 0x3fa   : > { %v911_v58 = vadd.f32 %v910_v53, %v909_v51 }
 0x3fc   : > { %v912_v62 = vrot.slane %v911_v58, 1 }
 0x3fe   : > { %v913_v2 = vadd.f32 %v912_v62, %v911_v58 }
 0x46b   : > { %v896_v54 = vpop.xlane.xlu1 %895 }
 0x46c   : > { %v897_v56 = vrot.slane %v896_v54, 4 }
 0x46e   : > { %v898_v57 = vadd.f32 %v897_v56, %v896_v54 }
 0x470   : > { %v899_v60 = vrot.slane %v898_v57, 2 }
 0x472   : > { %v900_v61 = vadd.f32 %v899_v60, %v898_v57 }
 0x474   : > { %v901_v63 = vrot.slane %v900_v61, 1 }
 0x476   : > { %v902_v1 = vadd.f32 %v901_v63, %v900_v61 }
 0x478   : > { %1210 = vpush %v902_v1 }
 0x479   : > { %1212 = vpush %v913_v2 }
 0x47a   : > { %1214 = vpush %v926_v3 }
 0x4a9   : > { %s1211_s21 = spop %1210 }
 0x4aa   : > { %s1213_s11 = spop %1212 }
 0x4ab   : > { %s915_s16 = sadd.f32 %s1213_s11, %s1211_s21  ;;  %s1215_s17 = spop %1214 }
 0x4ac   : > { %s928_s18 = smul.f32 2.0, %s1215_s17 }
 0x4ae   : > { %s929_s19 = ssub.f32 %s915_s16, %s928_s18 }
 0x4b0   : > { %s930_s20 = smul.f32 0.0625, %s929_s19 }
 0x4b2   : > { %v931_v4 = vstv %s930_s20 }
 0x4b3   : > { %932 = vst [vmem:[#allocation12] sm:$0x1] %v931_v4 }
 0x4b4 PF: > { %p1258_p12 = scmp.eq.s32.totalorder %s1561_s24, 1  ;;  %s941_s27 = sshll.u32 %s1655_s6, 4  ;;  %s942_s27 = int_to_ptr.hbm [resolvable:$true] %s941_s27 }
 0x4b5   : > { %s1509_s28 = smov [#allocation12]  }
 0x4b6   : > { %s939_s30 = sshll.u32 %s1509_s28, 4  ;;  %s940_s30 = int_to_ptr.vmem [resolvable:$true] %s939_s30 }
 0x4b7   : > { %1233 = dma.vmem_to_hbm [thread:$0]  (%p1258_p12), %s940_s30, 16, %s942_s27, [#allocation6]  }
 0x4b8   : > { %1486 = dma.done.wait (%p1258_p12), [#allocation6], 16  }
 0x4b9   : > { %1488 = vsyncadd (%p1258_p12), [#allocation6], 4294967280 }
 0x4ba PF: > { %s26_s23 = sadd.s32 1, %s1499_s23   ;;  %s1658_s21 = smov %s1495_s22 }
 0x4bb   : > { %p23_p13 = scmp.ge.s32.totalorder %s26_s23, 4   ;;  %s1659_s22 = smov %s1661_s15 }
 0x4bd   :  { %25 = sbr.rel (!%p23_p13) target bundleno = 8 (0x8), region = 139 }
 0x4c2   :  { %955 = vsyncpa [#allocation5], 1 }
 0x4c3   :  { %957 = vsyncpa [#allocation5 + $0x1], 1 }
 0x4c4   :  { %958 = vsyncpa [#allocation8], 1 }
 0x4c5   :  { %960 = vsyncpa [#allocation8 + $0x1], 1 }
 0x4c6   :  { %961 = vsyncpa [#allocation11], 1 }
 0x4c7   :  { %963 = vsyncpa [#allocation11 + $0x1], 1 }
 0x4c8   :  { %964 = vsyncpa [#allocation6], 1 }
 0x4c9   :  { %966 = vsyncpa [#allocation6 + $0x1], 1 }

</bundles_post_ra>
